<compile_context>
chip_gen: v6e
topology: v6e:2x2x1
jax: 0.10.0
libtpu: 0.0.40
codegen_flags: <defaults>
</compile_context>

<pallas_src>
import functools

import jax
import jax.numpy as jnp
import numpy as np
from jax.experimental import pallas as pl
from jax.experimental.pallas import tpu as pltpu


def _sepconv_kernel(x_ref, w_ref, o_ref, *, K, tR, tR_in, Wo, Cin, Cout,
                    KKC_pad, stride, dilation):
    """One (batch, output-row-tile) block per grid step.

    x_ref : (1, Hp, Wp, Cin)       whole zero-padded NHWC image of batch n
    w_ref : (KKC_pad, Cout_mxu)    fused depthwise*pointwise weights
    o_ref : (1, tR*Wo, Cout)       output tile (real channel count)
    """
    r = pl.program_id(1)
    row0 = pl.multiple_of(r * (tR * stride), tR * stride)
    x = x_ref[0, pl.ds(row0, tR_in)]                      # (tR_in, Wp, Cin)

    # im2col: K*K shifted patches concatenated along the channel axis, plus a
    # zero pad up to KKC_pad so the MXU contraction is fully lane-aligned.
    taps = []
    for kh in range(K):
        h0 = kh * dilation
        for kw in range(K):
            w0 = kw * dilation
            if stride == 1:
                patch = x[h0:h0 + tR, w0:w0 + Wo, :]      # (tR, Wo, Cin)
            else:
                # TODO(synk): for stride > 1, space-to-depth the W axis in the
                # wrapper so this slice is unit-stride along the sublane axis.
                patch = x[h0:h0 + (tR - 1) * stride + 1:stride,
                          w0:w0 + (Wo - 1) * stride + 1:stride, :]
            # Free re-indexing when Wo % 8 == 0 (sublane-granule collapse).
            taps.append(patch.reshape(tR * Wo, Cin))
    pad = KKC_pad - K * K * Cin
    if pad:
        taps.append(jnp.zeros((tR * Wo, pad), dtype=x.dtype))
    lhs = jnp.concatenate(taps, axis=-1) if len(taps) > 1 else taps[0]

    # Single MXU contraction; f32 accumulation stays in vregs (16 vregs at
    # tR*Wo=128), written out exactly once.
    acc = jnp.dot(lhs, w_ref[...], preferred_element_type=jnp.float32)

    # Only the real Cout channels go back to HBM.
    o_ref[0] = acc[:, :Cout].astype(o_ref.dtype)


def _pick_row_tile(N, Ho, Wo, Cout, out_itemsize):
    # ~2 MiB output tiles, but keep >= ~8 total grid steps when the image is
    # big enough (pipelining + both v7x TensorCores even at batch 1), and keep
    # tR a multiple of 8 so output blocks stay sublane-aligned.
    by_bytes = max(1, (2 << 20) // max(1, Wo * Cout * out_itemsize))
    by_steps = max(1, (N * Ho + 7) // 8)
    tr = min(Ho, by_bytes, by_steps)
    if tr < Ho:
        tr = min(Ho, max(8, (tr // 8) * 8))
    return tr


def separable_conv2d(x_nchw, w_dw, w_pw, *, stride=1, padding=0, dilation=1,
                     row_tile=None, compute_dtype=None):
    """SeparableConv2d forward.

    x_nchw : (N, Cin, H, W)      input, NCHW (PyTorch convention)
    w_dw   : (Cin, 1, K, K)      depthwise weights (PyTorch layout, groups=Cin)
    w_pw   : (Cout, Cin, 1, 1)   pointwise weights (PyTorch layout)
    returns: (N, Cout, Ho, Wo)   output, NCHW
    """
    N, Cin, H, W = map(int, x_nchw.shape)
    K = int(w_dw.shape[-1])
    Cout = int(w_pw.shape[0])
    out_dtype = x_nchw.dtype
    if compute_dtype is None:
        compute_dtype = x_nchw.dtype        # use jnp.bfloat16 on v6e/v7x

    Ho = (H + 2 * padding - dilation * (K - 1) - 1) // stride + 1
    Wo = (W + 2 * padding - dilation * (K - 1) - 1) // stride + 1
    in_item = jnp.dtype(compute_dtype).itemsize
    out_item = jnp.dtype(out_dtype).itemsize

    # ---- tiling -----------------------------------------------------------
    tR = _pick_row_tile(N, Ho, Wo, Cout, out_item) if row_tile is None \
        else int(row_tile)
    tR = max(1, min(tR, Ho))
    if pl.cdiv(Ho, tR) > 1 and (tR * Wo) % 8 != 0:
        tR = min(Ho, ((tR + 7) // 8) * 8)   # sublane-aligned output blocks
    R_T = int(pl.cdiv(Ho, tR))
    Ho_pad = R_T * tR
    tR_in = (tR - 1) * stride + (K - 1) * dilation + 1

    Cout_mxu = ((Cout + 127) // 128) * 128  # lane-dense MXU result (VMEM only)
    KKC = K * K * Cin
    KKC_pad = ((KKC + 127) // 128) * 128    # lane-aligned contraction

    # ---- layout + zero padding (no halo duplication) ----------------------
    x_nhwc = jnp.transpose(x_nchw, (0, 2, 3, 1)).astype(compute_dtype)
    Hp_need = (Ho_pad - 1) * stride + (K - 1) * dilation + 1
    pad_bottom = max(0, Hp_need - (H + padding))
    x_pad = jnp.pad(x_nhwc, ((0, 0), (padding, pad_bottom),
                             (padding, padding), (0, 0)))
    Hp = H + padding + pad_bottom
    Wp = W + 2 * padding

    # Fused weight: W_eff[(kh*K + kw)*Cin + c, o] = w_dw[c, kh, kw] * w_pw[o, c]
    wdw = w_dw[:, 0, :, :].astype(jnp.float32)              # (Cin, K, K)
    wpw = w_pw[:, :, 0, 0].astype(jnp.float32)              # (Cout, Cin)
    w_eff = jnp.einsum('ckl,oc->klco', wdw, wpw)            # (K, K, Cin, Cout)
    w_eff = w_eff.reshape(KKC, Cout)
    w_eff = jnp.pad(w_eff, ((0, KKC_pad - KKC), (0, Cout_mxu - Cout)))
    w_eff = w_eff.astype(compute_dtype)

    kernel = functools.partial(_sepconv_kernel, K=K, tR=tR, tR_in=tR_in,
                               Wo=Wo, Cin=Cin, Cout=Cout, KKC_pad=KKC_pad,
                               stride=stride, dilation=dilation)

    in_block = Hp * Wp * Cin * in_item
    w_block = KKC_pad * Cout_mxu * in_item
    out_block = tR * Wo * Cout * out_item
    vmem_need = 2 * (in_block + w_block + out_block)        # double-buffered
    vmem_limit = int(max(32 * 2**20, min(100 * 2**20, vmem_need + (8 << 20))))

    cost = pl.CostEstimate(
        flops=2 * N * R_T * (tR * Wo) * KKC_pad * Cout_mxu,
        transcendentals=0,
        bytes_accessed=(N * Hp * Wp * Cin * in_item         # image: once/batch
                        + KKC_pad * Cout_mxu * in_item
                        + N * Ho_pad * Wo * Cout * out_item),
    )

    out_flat = pl.pallas_call(
        kernel,
        out_shape=jax.ShapeDtypeStruct((N, Ho_pad * Wo, Cout), out_dtype),
        grid_spec=pltpu.PrefetchScalarGridSpec(
            num_scalar_prefetch=0,
            grid=(N, R_T),
            in_specs=[
                # Whole padded image of batch n.  The block index depends only
                # on n, so Pallas DMAs it once per batch and re-uses it across
                # the row-tile axis; every grid step slices its own tR_in-row
                # window from VMEM (no wrapper-side duplicated-halo copy).
                # TODO(synk): for very large H*W*Cin switch to element-offset
                # halo row blocks / manual DMA to bound the VMEM footprint.
                pl.BlockSpec((1, Hp, Wp, Cin), lambda n, r: (n, 0, 0, 0)),
                pl.BlockSpec((KKC_pad, Cout_mxu), lambda n, r: (0, 0)),
            ],
            out_specs=pl.BlockSpec((1, tR * Wo, Cout), lambda n, r: (n, r, 0)),
        ),
        compiler_params=pltpu.CompilerParams(
            # Both grid axes are independent -> megacore can shard either one
            # (keeps both v7x TensorCores busy even at batch 1 thanks to the
            # multi-step row-tile axis).
            dimension_semantics=("parallel", "parallel"),
            vmem_limit_bytes=vmem_limit,
        ),
        cost_estimate=cost,
    )(x_pad, w_eff)

    out = out_flat.reshape(N, Ho_pad, Wo, Cout)[:, :Ho]
    # TODO(synk): NHWC consumers can take `out` directly and skip this final
    # transpose (it is a full extra HBM pass over the output).
    return jnp.transpose(out, (0, 3, 1, 2))                  # (N, Cout, Ho, Wo)


def _reference(x_nchw, w_dw, w_pw, *, stride, padding, dilation):
    """Plain-JAX reference: depthwise conv (groups=Cin) then 1x1 conv."""
    Cin = x_nchw.shape[1]
    dw = jax.lax.conv_general_dilated(
        x_nchw, w_dw,
        window_strides=(stride, stride),
        padding=((padding, padding), (padding, padding)),
        rhs_dilation=(dilation, dilation),
        dimension_numbers=("NCHW", "OIHW", "NCHW"),
        feature_group_count=Cin)
    pw = jax.lax.conv_general_dilated(
        dw, w_pw, window_strides=(1, 1), padding="VALID",
        dimension_numbers=("NCHW", "OIHW", "NCHW"))
    return pw


if __name__ == "__main__":
    # Module config: SeparableConv2d(in_channels=4, out_channels=8,
    #                                kernel_size=3, stride=1, padding=1,
    #                                dilation=1, bias=False)
    N, Cin, H, W = 2, 4, 16, 16
    Cout, K = 8, 3
    stride, padding, dilation = 1, 1, 1

    key = jax.random.PRNGKey(0)
    k_x, k_dw, k_pw = jax.random.split(key, 3)

    x = jax.random.normal(k_x, (N, Cin, H, W), dtype=jnp.float32)
    # PyTorch-shaped synthetic weights:
    #   conv1.weight    : (Cin, 1, K, K)   depthwise (groups=Cin)
    #   pointwise.weight: (Cout, Cin, 1, 1)
    w_dw = jax.random.normal(k_dw, (Cin, 1, K, K), dtype=jnp.float32) * (1.0 / K)
    w_pw = jax.random.normal(k_pw, (Cout, Cin, 1, 1), dtype=jnp.float32) * (1.0 / Cin)

    # Default heuristic -> row_tile=8, grid (N=2, row_tiles=2): exercises the
    # spatial tiling, per-batch input re-use and the pipelined output path.
    out = separable_conv2d(x, w_dw, w_pw, stride=stride, padding=padding,
                           dilation=dilation)
    out = jax.block_until_ready(out)

    ref = _reference(x, w_dw, w_pw,
                     stride=stride, padding=padding, dilation=dilation)
    np.testing.assert_allclose(np.asarray(out), np.asarray(ref),
                               rtol=1e-4, atol=1e-4)

    print("KERNEL_OK")
</pallas_src>

<mosaic_0001>
module attributes {stable_mosaic.version = 11 : i64} {
  func.func @_sepconv_kernel(%arg0: i32, %arg1: i32, %arg2: memref<1x18x18x4xf32, #tpu.memory_space<vmem>>, %arg3: memref<128x128xf32, #tpu.memory_space<vmem>>, %arg4: memref<1x128x8xf32, #tpu.memory_space<vmem>>) attributes {dimension_semantics = [#tpu.dimension_semantics<parallel>, #tpu.dimension_semantics<parallel>], iteration_bounds = array<i64: 2, 2>, scalar_prefetch = 0 : i64, scratch_operands = 0 : i64, tpu.core_type = #tpu.core_type<tc>, window_params = [{transform_indices = @transform_0, window_bounds = array<i64: 1, 18, 18, 4>}, {pipeline_mode = #tpu.pipeline_mode<synchronous>, transform_indices = @transform_1, window_bounds = array<i64: 128, 128>}, {transform_indices = @transform_2, window_bounds = array<i64: 1, 128, 8>}]} {
    %c8_i32 = arith.constant 8 : i32
    %0 = arith.muli %arg1, %c8_i32 : i32
    %1 = tpu.assume_multiple %0, 8 : i32
    %c0 = arith.constant 0 : index
    %2 = arith.index_cast %1 : i32 to index
    %c0_0 = arith.constant 0 : index
    %c0_1 = arith.constant 0 : index
    %3 = vector.load %arg2[%c0, %2, %c0_0, %c0_1] : memref<1x18x18x4xf32, #tpu.memory_space<vmem>>, vector<1x10x18x4xf32>
    %4 = vector.shape_cast %3 : vector<1x10x18x4xf32> to vector<10x18x4xf32>
    %5 = vector.extract_strided_slice %4 {offsets = [0, 0, 0], sizes = [8, 16, 4], strides = [1, 1, 1]} : vector<10x18x4xf32> to vector<8x16x4xf32>
    %6 = vector.shape_cast %5 : vector<8x16x4xf32> to vector<128x4xf32>
    %7 = vector.extract_strided_slice %4 {offsets = [0, 1, 0], sizes = [8, 16, 4], strides = [1, 1, 1]} : vector<10x18x4xf32> to vector<8x16x4xf32>
    %8 = vector.shape_cast %7 : vector<8x16x4xf32> to vector<128x4xf32>
    %9 = vector.extract_strided_slice %4 {offsets = [0, 2, 0], sizes = [8, 16, 4], strides = [1, 1, 1]} : vector<10x18x4xf32> to vector<8x16x4xf32>
    %10 = vector.shape_cast %9 : vector<8x16x4xf32> to vector<128x4xf32>
    %11 = vector.extract_strided_slice %4 {offsets = [1, 0, 0], sizes = [8, 16, 4], strides = [1, 1, 1]} : vector<10x18x4xf32> to vector<8x16x4xf32>
    %12 = vector.shape_cast %11 : vector<8x16x4xf32> to vector<128x4xf32>
    %13 = vector.extract_strided_slice %4 {offsets = [1, 1, 0], sizes = [8, 16, 4], strides = [1, 1, 1]} : vector<10x18x4xf32> to vector<8x16x4xf32>
    %14 = vector.shape_cast %13 : vector<8x16x4xf32> to vector<128x4xf32>
    %15 = vector.extract_strided_slice %4 {offsets = [1, 2, 0], sizes = [8, 16, 4], strides = [1, 1, 1]} : vector<10x18x4xf32> to vector<8x16x4xf32>
    %16 = vector.shape_cast %15 : vector<8x16x4xf32> to vector<128x4xf32>
    %17 = vector.extract_strided_slice %4 {offsets = [2, 0, 0], sizes = [8, 16, 4], strides = [1, 1, 1]} : vector<10x18x4xf32> to vector<8x16x4xf32>
    %18 = vector.shape_cast %17 : vector<8x16x4xf32> to vector<128x4xf32>
    %19 = vector.extract_strided_slice %4 {offsets = [2, 1, 0], sizes = [8, 16, 4], strides = [1, 1, 1]} : vector<10x18x4xf32> to vector<8x16x4xf32>
    %20 = vector.shape_cast %19 : vector<8x16x4xf32> to vector<128x4xf32>
    %21 = vector.extract_strided_slice %4 {offsets = [2, 2, 0], sizes = [8, 16, 4], strides = [1, 1, 1]} : vector<10x18x4xf32> to vector<8x16x4xf32>
    %22 = vector.shape_cast %21 : vector<8x16x4xf32> to vector<128x4xf32>
    %cst = arith.constant 0.000000e+00 : f32
    %23 = vector.broadcast %cst : f32 to vector<128x92xf32>
    %24 = tpu.concatenate %6, %8, %10, %12, %14, %16, %18, %20, %22, %23 in 1 : vector<128x4xf32>, vector<128x4xf32>, vector<128x4xf32>, vector<128x4xf32>, vector<128x4xf32>, vector<128x4xf32>, vector<128x4xf32>, vector<128x4xf32>, vector<128x4xf32>, vector<128x92xf32> -> vector<128x128xf32>
    %c0_2 = arith.constant 0 : index
    %c0_3 = arith.constant 0 : index
    %25 = vector.load %arg3[%c0_2, %c0_3] : memref<128x128xf32, #tpu.memory_space<vmem>>, vector<128x128xf32>
    %cst_4 = arith.constant dense<0.000000e+00> : vector<128x128xf32>
    %26 = tpu.matmul %24, %25, %cst_4 {dimension_numbers = #tpu.dot_dimension_numbers<[1], [0], [0], [1], [0, 0, 1, 1], [], []>} : vector<128x128xf32>, vector<128x128xf32>, vector<128x128xf32> -> vector<128x128xf32>
    %27 = vector.extract_strided_slice %26 {offsets = [0, 0], sizes = [128, 8], strides = [1, 1]} : vector<128x128xf32> to vector<128x8xf32>
    %c0_5 = arith.constant 0 : index
    %c0_6 = arith.constant 0 : index
    %c0_7 = arith.constant 0 : index
    %28 = vector.load %arg4[%c0_5, %c0_6, %c0_7] : memref<1x128x8xf32, #tpu.memory_space<vmem>>, vector<1x128x8xf32>
    %29 = vector.shape_cast %28 : vector<1x128x8xf32> to vector<128x8xf32>
    %30 = vector.shape_cast %27 : vector<128x8xf32> to vector<1x128x8xf32>
    tpu.vector_store %arg4[%c0_5, %c0_6, %c0_7], %30 {strides = array<i32>} : memref<1x128x8xf32, #tpu.memory_space<vmem>>, vector<1x128x8xf32>,
    return
  }
  func.func @transform_0(%arg0: i32, %arg1: i32) -> (i32, i32, i32, i32) {
    %c0_i32 = arith.constant 0 : i32
    %c0_i32_0 = arith.constant 0 : i32
    %c0_i32_1 = arith.constant 0 : i32
    %c0_i32_2 = arith.constant 0 : i32
    return %arg0, %c0_i32, %c0_i32_0, %c0_i32_1 : i32, i32, i32, i32
  }
  func.func @transform_1(%arg0: i32, %arg1: i32) -> (i32, i32) {
    %c0_i32 = arith.constant 0 : i32
    %c0_i32_0 = arith.constant 0 : i32
    %c0_i32_1 = arith.constant 0 : i32
    return %c0_i32, %c0_i32_0 : i32, i32
  }
  func.func @transform_2(%arg0: i32, %arg1: i32) -> (i32, i32, i32) {
    %c0_i32 = arith.constant 0 : i32
    %c0_i32_0 = arith.constant 0 : i32
    return %arg0, %arg1, %c0_i32 : i32, i32, i32
  }
}

</mosaic_0001>

<bundles_post_ra>
// kernel: tpu_custom_call.1
= control target key start
LH: loop header
LB: loop body
LE: loop exit
PB: predicated region body
PF: predicated region fallthrough
CT: control target
= control target key end

     0   :  { %s1393_s9 = smov 0   ;;  %s1395_s10 = smov 0   ;;  %s2190_s0 = inlined_call_operand.vmem [shape: f32[2,18,18,4], index: 0, kind: input, shape index: {}]   ;;  %s2191_s1 = inlined_call_operand.vmem [shape: f32[128,128], index: 1, kind: input, shape index: {}]   ;;  %s2192_s2 = inlined_call_operand.vmem [shape: f32[2,256,8], index: 2, kind: output, shape index: {}]  }
   0x1   :  { %s1397_s11 = smov 0   ;;  %s1399_s12 = smov 0  }
   0x2   :  { %s1401_s13 = smov 0  }
   0x3 LB: > { %s21_s14 = sadd.s32 1, %s1360_s11  ;;  %s24_s15 = sadd.s32 1, %s1364_s12  ;;  %s1368_s13 = sphi %s1401_s13, %s12_s13   ;;  %s1364_s12 = sphi %s1399_s12, %s2223_s12   ;;  %s1360_s11 = sphi %s1397_s11, %s2222_s11   ;;  %s1356_s10 = sphi %s1395_s10, %s2221_s10   ;;  %s1352_s9 = sphi %s1393_s9, %s2220_s9  }
   0x4   : > { %p22_p0 = scmp.ge.s32.totalorder %s21_s14, 2  ;;  %p1136_p1 = scmp.ge.s32.totalorder %s1368_s13, 1 }
   0x5   : > { %p126_p2 = scmp.lt.s32.totalorder %s1368_s13, 5 }
   0x6   : > { %s2225_s14 = smov (%p22_p0, %s21_s14), 0  ;;  %s2227_s15 = smov (!%p22_p0, %s24_s15), %s1364_s12 }
   0x7   : > { %p127_p3 = pnand %p1136_p1, %p126_p2  ;;  %p26_p4 = scmp.ge.s32.totalorder %s2227_s15, 2 }
   0x9   : > { %s2229_s15 = smov (%p26_p4, %s2227_s15), 0  ;;  %130 = sbr.rel (%p127_p3) target bundleno = 590 (0x24e), region = 28 }
   0xe   : > { %p152_p5 = scmp.lt.s32.totalorder %s1356_s10, 1  ;;  %s1142_s16 = smul.u32 192, %s1352_s9  ;;  %vm224_vm0 = vcmask 1046528   ;;  %vm265_vm1 = vcmask 1045504   ;;  %v884_v54 = vld [vmem:[%s2191_s1 + $0x78] sm:$0xff]  ;;  %v883_v55 = vld [vmem:[%s2191_s1 + $0x70] sm:$0xff] }
   0xf   : > { %s1370_s22 = smov 4   ;;  %s1371_s23 = smov 8   ;;  %1193 = vmatprep.subr.mxu0 %v884_v54  ;;  %1249 = vmatprep.subr.mxu1 %v884_v54  ;;  %v882_v58 = vld [vmem:[%s2191_s1 + $0x68] sm:$0xff]  ;;  %v881_v63 = vld [vmem:[%s2191_s1 + $0x60] sm:$0xff]  ;;  %vm716_vm2 = vcmask 31744   ;;  %vm733_vm3 = vcmask 64512  }
  0x10   : > { %s2231_s10 = smov (!%p152_p5, %s1356_s10), 1  ;;  %s1372_s24 = smov 12   ;;  %1194 = vmatpush3.msra.mxu0 %v884_v54  ;;  %1265 = vmatpush3.msra.mxu1 %v884_v54  ;;  %vm750_vm4 = vcmask 97280   ;;  %vm767_vm5 = vcmask 130048   ;;  %vm784_vm6 = vcmask 162816   ;;  %vm801_vm7 = vcmask 195584  }
  0x11   : > { %s1281_s17 = smul.u32 432, %s2231_s10  ;;  %s1373_s25 = smov 16   ;;  %1195 = vmatprep.subr.mxu0 %v883_v55  ;;  %1250 = vmatprep.subr.mxu1 %v883_v55  ;;  %vm818_vm8 = vcmask 228352   ;;  %vm835_vm9 = vcmask 261120   ;;  %vm852_vm10 = vcmask 293888  }
  0x12   : > { %s1374_s26 = smov 20   ;;  %s1375_s27 = smov 24   ;;  %1196 = vmatpush3.msra.mxu0 %v883_v55  ;;  %1266 = vmatpush3.msra.mxu1 %v883_v55 }
  0x13   : > { %s156_s20 = scalar_lea.vmem %s2190_s0, %s1281_s17  ;;  %1197 = vmatprep.subr.mxu0 %v882_v58  ;;  %1251 = vmatprep.subr.mxu1 %v882_v58  ;;  %s1376_s19 = smov 28  }
  0x14   : > { %s1432_s21 = scalar_lea.vmem %s156_s20, %s1142_s16  ;;  %1198 = vmatpush3.msra.mxu0 %v882_v58  ;;  %1267 = vmatpush3.msra.mxu1 %v882_v58  ;;  %s1377_s18 = smov 32  }
  0x15   : > { %v1435_v0 = vld [vmem:[%s1432_s21 + $0x8] sm:$0xff]  ;;  %v172_v1 = vld [vmem:[%s1432_s21 + $0x10] sm:$0x3]  ;;  %v1439_v2 = vld [vmem:[%s1432_s21] sm:$0xff]  ;;  %1199 = vmatprep.subr.mxu0 %v881_v63  ;;  %1252 = vmatprep.subr.mxu1 %v881_v63 }
  0x16   : > { %v226_v3 = vrot.slane %v1435_v0, 1  ;;  %v228_v4 = vrot.slane %v172_v1, 1  ;;  %v225_v5 = vrot.slane %v1439_v2, 1  ;;  %v1444_v6 = vld [vmem:[%s1432_s21 + $0x68] sm:$0xff]  ;;  %v184_v7 = vld [vmem:[%s1432_s21 + $0x70] sm:$0x3]  ;;  %1200 = vmatpush3.msra.mxu0 %v881_v63  ;;  %1268 = vmatpush3.msra.mxu1 %v881_v63 }
  0x17   : > { %v246_v8 = vrot.slane %v1444_v6, 1  ;;  %v248_v9 = vrot.slane %v184_v7, 1  ;;  %v1449_v10 = vld [vmem:[%s1432_s21 + $0x60] sm:$0xff]  ;;  %v287_v14 = vrot.slane %v1444_v6, 2  ;;  %v266_v15 = vrot.slane %v1439_v2, 2  ;;  %v1485_v26 = vld [vmem:[%s1432_s21 + $0x78] sm:$0xff] }
  0x18   : > { %v229_v11 = vsel %vm224_vm0, %v226_v3, %v228_v4  ;;  %v227_v12 = vsel %vm224_vm0, %v225_v5, %v226_v3  ;;  %v245_v13 = vrot.slane %v1449_v10, 1  ;;  %v286_v18 = vrot.slane %v1449_v10, 2  ;;  %v1488_v27 = vld [vmem:[%s1432_s21 + $0x18] sm:$0xff]  ;;  %v1491_v28 = vld [vmem:[%s1432_s21 + $0x80] sm:$0xff]  ;;  %v187_v36 = vld [vmem:[%s1432_s21 + $0x88] sm:$0x3] }
  0x19   : > { %334 = vrot.lane.b32.xlu1 %v229_v11, %s1370_s22  ;;  %332 = vrot.lane.b32.xlu0 %v227_v12, %s1370_s22  ;;  %v1459_v16 = vsel %vm224_vm0, %v246_v8, %v248_v9  ;;  %v267_v19 = vrot.slane %v1435_v0, 2  ;;  %v289_v22 = vrot.slane %v184_v7, 2  ;;  %v269_v23 = vrot.slane %v172_v1, 2  ;;  %v1494_v29 = vld [vmem:[%s1432_s21 + $0x20] sm:$0xff]  ;;  %v175_v37 = vld [vmem:[%s1432_s21 + $0x28] sm:$0x3] }
  0x1a   : > { %v1462_v17 = vsel %vm224_vm0, %v245_v13, %v246_v8  ;;  %v1471_v20 = vsel %vm265_vm1, %v286_v18, %v287_v14  ;;  %v250_v30 = vrot.slane %v1485_v26, 1  ;;  %v251_v31 = vrot.slane %v1491_v28, 1  ;;  %v1552_v52 = vld [vmem:[%s1432_s21 + $0x90] sm:$0xff]  ;;  %v1571_v56 = vld [vmem:[%s1432_s21 + $0x98] sm:$0xff]  ;;  %v1611_v7 = vld [vmem:[%s1432_s21 + $0xa0] sm:$0x3] }
  0x1b   : > { %v268_v21 = vsel %vm265_vm1, %v266_v15, %v267_v19  ;;  %v1478_v24 = vsel %vm265_vm1, %v287_v14, %v289_v22  ;;  %v270_v25 = vsel %vm265_vm1, %v267_v19, %v269_v23  ;;  %v230_v32 = vrot.slane %v1488_v27, 1  ;;  %v1555_v53 = vld [vmem:[%s1432_s21 + $0x30] sm:$0xff]  ;;  %v1574_v57 = vld [vmem:[%s1432_s21 + $0x38] sm:$0xff]  ;;  %v1614_v8 = vld [vmem:[%s1432_s21 + $0x40] sm:$0x3] }
  0x1c   : > { %v231_v33 = vrot.slane %v1494_v29, 1  ;;  %v1509_v34 = vsel %vm224_vm0, %v250_v30, %v251_v31  ;;  %v253_v38 = vrot.slane %v187_v36, 1  ;;  %v233_v39 = vrot.slane %v175_v37, 1  ;;  %2206 = vst [vmem:[#allocation6_spill] sm:$0xff] %v1574_v57  ;;  %v880_v1 = vld [vmem:[%s2191_s1 + $0x58] sm:$0xff]  ;;  %v879_v5 = vld [vmem:[%s2191_s1 + $0x50] sm:$0xff] }
  0x1d   : > { %350 = vrot.lane.b32.xlu1 %v1459_v16, %s1370_s22  ;;  %348 = vrot.lane.b32.xlu0 %v1462_v17, %s1370_s22  ;;  %2202 = vst [vmem:[#allocation2_spill] sm:$0xff] %v1509_v34  ;;  %v291_v40 = vrot.slane %v1485_v26, 2  ;;  %v292_v41 = vrot.slane %v1491_v28, 2  ;;  %v271_v44 = vrot.slane %v1488_v27, 2  ;;  %v272_v45 = vrot.slane %v1494_v29, 2  ;;  %v878_v9 = vld [vmem:[%s2191_s1 + $0x48] sm:$0xff] }
  0x1e   : > { %v232_v35 = vsel %vm224_vm0, %v230_v32, %v231_v33  ;;  %v1523_v42 = vsel %vm224_vm0, %v251_v31, %v253_v38  ;;  %v234_v43 = vsel %vm224_vm0, %v231_v33, %v233_v39  ;;  %v294_v48 = vrot.slane %v187_v36, 2  ;;  %1201 = vmatprep.subr.mxu0 %v880_v1  ;;  %1253 = vmatprep.subr.mxu1 %v880_v1  ;;  %v877_v11 = vld [vmem:[%s2191_s1 + $0x40] sm:$0xff]  ;;  %v876_v14 = vld [vmem:[%s2191_s1 + $0x38] sm:$0xff]  ;;  %v874_v30 = vld [vmem:[%s2191_s1 + $0x28] sm:$0xff] }
  0x1f   : > { %2203 = vst [vmem:[#allocation3_spill] sm:$0xff] %v1523_v42  ;;  %v1532_v46 = vsel %vm265_vm1, %v291_v40, %v292_v41  ;;  %v273_v47 = vsel %vm265_vm1, %v271_v44, %v272_v45  ;;  %v274_v49 = vrot.slane %v175_v37, 2  ;;  %v255_v59 = vrot.slane %v1552_v52, 1  ;;  %1202 = vmatpush3.msra.mxu0 %v880_v1  ;;  %1269 = vmatpush3.msra.mxu1 %v880_v1  ;;  %v873_v33 = vld [vmem:[%s2191_s1 + $0x20] sm:$0xff]  ;;  %v871_v36 = vld [vmem:[%s2191_s1 + $0x10] sm:$0xff]  ;;  %v870_v37 = vld [vmem:[%s2191_s1 + $0x8] sm:$0xff] }
  0x20   : > { %2204 = vst [vmem:[#allocation4_spill] sm:$0xff] %v1532_v46  ;;  %v1545_v50 = vsel %vm265_vm1, %v292_v41, %v294_v48  ;;  %v256_v60 = vrot.slane %v1571_v56, 1  ;;  %v235_v61 = vrot.slane %v1555_v53, 1  ;;  %v236_v62 = vrot.slane %v1574_v57, 1  ;;  %1203 = vmatprep.subr.mxu0 %v879_v5  ;;  %1254 = vmatprep.subr.mxu1 %v879_v5  ;;  %v869_v40 = vld [vmem:[%s2191_s1] sm:$0xff]  ;;  %v1699_v44 = vld [vmem:[%s1432_s21 + $0xa8] sm:$0xff] }
  0x21   : > { %396 = vrot.lane.b32.xlu1 %v1471_v20, %s1371_s23  ;;  %380 = vrot.lane.b32.xlu0 %v268_v21, %s1371_s23  ;;  %2205 = vst [vmem:[#allocation5_spill] sm:$0xff] %v1545_v50  ;;  %v275_v51 = vsel %vm265_vm1, %v272_v45, %v274_v49  ;;  %v258_v12 = vrot.slane %v1611_v7, 1  ;;  %v238_v13 = vrot.slane %v1614_v8, 1  ;;  %v296_v15 = vrot.slane %v1552_v52, 2  ;;  %2207 = vst [vmem:[#allocation7_spill] sm:$0xff] %v1699_v44  ;;  %v1702_v45 = vld [vmem:[%s1432_s21 + $0x48] sm:$0xff] }
  0x22   : > { %v1598_v3 = vsel %vm224_vm0, %v255_v59, %v256_v60  ;;  %v1601_v4 = vsel %vm224_vm0, %v235_v61, %v236_v62  ;;  %1204 = vmatpush3.msra.mxu0 %v879_v5  ;;  %1270 = vmatpush3.msra.mxu1 %v879_v5  ;;  %v297_v18 = vrot.slane %v1571_v56, 2  ;;  %v276_v22 = vrot.slane %v1555_v53, 2  ;;  %2208 = vst [vmem:[#allocation8_spill] sm:$0xff] %v1702_v45  ;;  %v1723_v58 = vld [vmem:[%s1432_s21 + $0xb0] sm:$0xff] }
  0x23   : > { %1205 = vmatprep.subr.mxu0 %v878_v9  ;;  %1255 = vmatprep.subr.mxu1 %v878_v9  ;;  %v1638_v19 = vsel %vm224_vm0, %v256_v60, %v258_v12  ;;  %v1641_v21 = vsel %vm224_vm0, %v236_v62, %v238_v13  ;;  %v277_v23 = vrot.slane %v1574_v57, 2  ;;  %v299_v38 = vrot.slane %v1611_v7, 2  ;;  %2209 = vst [vmem:[#allocation9_spill] sm:$0xff] %v1723_v58  ;;  %v1726_v59 = vld [vmem:[%s1432_s21 + $0x50] sm:$0xff] }
  0x24   : > { %1206 = vmatpush3.msra.mxu0 %v878_v9  ;;  %1271 = vmatpush3.msra.mxu1 %v878_v9  ;;  %v298_v31 = vsel %vm265_vm1, %v296_v15, %v297_v18  ;;  %v279_v39 = vrot.slane %v1614_v8, 2  ;;  %2210 = vst [vmem:[#allocation10_spill] sm:$0xff] %v1726_v59  ;;  %v260_v60 = vrot.slane %v1699_v44, 1  ;;  %v261_v61 = vrot.slane %v1723_v58, 1  ;;  %v193_v9 = vld [vmem:[%s1432_s21 + $0xb8] sm:$0x3] }
  0x25   : > { %398 = vrot.lane.b32.xlu1 %v1478_v24, %s1371_s23  ;;  %382 = vrot.lane.b32.xlu0 %v270_v25, %s1371_s23  ;;  %v875_v25 = vld [vmem:[%s2191_s1 + $0x30] sm:$0xff]  ;;  %v278_v32 = vsel %vm265_vm1, %v276_v22, %v277_v23  ;;  %v300_v41 = vsel %vm265_vm1, %v297_v18, %v299_v38  ;;  %v240_v62 = vrot.slane %v1702_v45, 1  ;;  %v241_v63 = vrot.slane %v1726_v59, 1 }
  0x26   : > { %1207 = vmatprep.subr.mxu0 %v877_v11  ;;  %1256 = vmatprep.subr.mxu1 %v877_v11 }
  0x27   : > { %1208 = vmatpush3.msra.mxu0 %v877_v11  ;;  %1272 = vmatpush3.msra.mxu1 %v877_v11  ;;  %v242_v5 = vsel %vm224_vm0, %v240_v62, %v241_v63  ;;  %v181_v11 = vld [vmem:[%s1432_s21 + $0x58] sm:$0x3] }
  0x28   : > { %1209 = vmatprep.subr.mxu0 %v876_v14  ;;  %1257 = vmatprep.subr.mxu1 %v876_v14  ;;  %v243_v15 = vrot.slane %v181_v11, 1 }
  0x29   : > { %444 = vrot.lane.b32.xlu1 %v1485_v26, %s1372_s24  ;;  %428 = vrot.lane.b32.xlu0 %v1488_v27, %s1372_s24 }
  0x2a   : > { %1210 = vmatpush3.msra.mxu0 %v876_v14  ;;  %1273 = vmatpush3.msra.mxu1 %v876_v14  ;;  %v263_v14 = vrot.slane %v193_v9, 1  ;;  %v244_v22 = vsel %vm224_vm0, %v241_v63, %v243_v15 }
  0x2b   : > { %1211 = vmatprep.subr.mxu0 %v875_v25  ;;  %1258 = vmatprep.subr.mxu1 %v875_v25 }
  0x2c   : > { %1212 = vmatpush3.msra.mxu0 %v875_v25  ;;  %1274 = vmatpush3.msra.mxu1 %v875_v25  ;;  %v302_v25 = vrot.slane %v1723_v58, 2 }
  0x2d   : > { %446 = vrot.lane.b32.xlu1 %v1491_v28, %s1372_s24  ;;  %430 = vrot.lane.b32.xlu0 %v1494_v29, %s1372_s24 }
  0x2e   : > { %1213 = vmatprep.subr.mxu0 %v874_v30  ;;  %1259 = vmatprep.subr.mxu1 %v874_v30 }
  0x2f   : > { %1214 = vmatpush3.msra.mxu0 %v874_v30  ;;  %1275 = vmatpush3.msra.mxu1 %v874_v30  ;;  %v281_v30 = vrot.slane %v1702_v45, 2 }
  0x30   : > { %1215 = vmatprep.subr.mxu0 %v873_v33  ;;  %1260 = vmatprep.subr.mxu1 %v873_v33 }
  0x31   : > { %492 = vrot.lane.b32.xlu1 %v1509_v34, %s1373_s25  ;;  %476 = vrot.lane.b32.xlu0 %v232_v35, %s1373_s25 }
  0x32   : > { %1216 = vmatpush3.msra.mxu0 %v873_v33  ;;  %1276 = vmatpush3.msra.mxu1 %v873_v33 }
  0x35   : > { %352 = vrot.lane.b32.xlu1 %v1509_v34, %s1370_s22  ;;  %336 = vrot.lane.b32.xlu0 %v232_v35, %s1370_s22  ;;  %v872_v35 = vld [vmem:[%s2191_s1 + $0x18] sm:$0xff] }
  0x36   : > { %1217 = vmatprep.subr.mxu0 %v872_v35  ;;  %1261 = vmatprep.subr.mxu1 %v872_v35 }
  0x37   : > { %1218 = vmatpush3.msra.mxu0 %v872_v35  ;;  %1277 = vmatpush3.msra.mxu1 %v872_v35 }
  0x38   : > { %1219 = vmatprep.subr.mxu0 %v871_v36  ;;  %1262 = vmatprep.subr.mxu1 %v871_v36 }
  0x39   : > { %494 = vrot.lane.b32.xlu1 %v1523_v42, %s1373_s25  ;;  %478 = vrot.lane.b32.xlu0 %v234_v43, %s1373_s25 }
  0x3a   : > { %1220 = vmatpush3.msra.mxu0 %v871_v36  ;;  %1278 = vmatpush3.msra.mxu1 %v871_v36 }
  0x3b   : > { %1221 = vmatprep.subr.mxu0 %v870_v37  ;;  %1263 = vmatprep.subr.mxu1 %v870_v37 }
  0x3c   : > { %1222 = vmatpush3.msra.mxu0 %v870_v37  ;;  %1279 = vmatpush3.msra.mxu1 %v870_v37 }
  0x3d   : > { %540 = vrot.lane.b32.xlu1 %v1532_v46, %s1374_s26  ;;  %524 = vrot.lane.b32.xlu0 %v273_v47, %s1374_s26 }
  0x3e   : > { %1223 = vmatprep.subr.mxu0 %v869_v40  ;;  %1264 = vmatprep.subr.mxu1 %v869_v40 }
  0x3f   : > { %1224 = vmatpush3.msra.mxu0 %v869_v40  ;;  %1280 = vmatpush3.msra.mxu1 %v869_v40 }
  0x41   : > { %354 = vrot.lane.b32.xlu1 %v1523_v42, %s1370_s22  ;;  %338 = vrot.lane.b32.xlu0 %v234_v43, %s1370_s22  ;;  %v280_v43 = vsel %vm265_vm1, %v277_v23, %v279_v39  ;;  %v301_v23 = vrot.slane %v1699_v44, 2 }
  0x43   : > { %v303_v35 = vsel %vm265_vm1, %v301_v23, %v302_v25 }
  0x45   : > { %400 = vrot.lane.b32.xlu1 %v1532_v46, %s1371_s23  ;;  %384 = vrot.lane.b32.xlu0 %v273_v47, %s1371_s23 }
  0x49   : > { %542 = vrot.lane.b32.xlu1 %v1545_v50, %s1374_s26  ;;  %526 = vrot.lane.b32.xlu0 %v275_v51, %s1374_s26 }
  0x4d   : > { %588 = vrot.lane.b32.xlu1 %v1552_v52, %s1375_s27  ;;  %572 = vrot.lane.b32.xlu0 %v1555_v53, %s1375_s27 }
  0x51   : > { %402 = vrot.lane.b32.xlu1 %v1545_v50, %s1371_s23  ;;  %386 = vrot.lane.b32.xlu0 %v275_v51, %s1371_s23 }
  0x55   : > { %448 = vrot.lane.b32.xlu1 %v1552_v52, %s1372_s24  ;;  %432 = vrot.lane.b32.xlu0 %v1555_v53, %s1372_s24 }
  0x59   : > { %590 = vrot.lane.b32.xlu1 %v1571_v56, %s1375_s27  ;;  %574 = vrot.lane.b32.xlu0 %v1574_v57, %s1375_s27 }
  0x5d   : > { %636 = vrot.lane.b32.xlu1 %v1598_v3, %s1376_s19  ;;  %620 = vrot.lane.b32.xlu0 %v1601_v4, %s1376_s19 }
  0x61   : > { %450 = vrot.lane.b32.xlu1 %v1571_v56, %s1372_s24  ;;  %434 = vrot.lane.b32.xlu0 %v1574_v57, %s1372_s24 }
  0x65   : > { %496 = vrot.lane.b32.xlu1 %v1598_v3, %s1373_s25  ;;  %480 = vrot.lane.b32.xlu0 %v1601_v4, %s1373_s25 }
  0x69   : > { %638 = vrot.lane.b32.xlu1 %v1638_v19, %s1376_s19  ;;  %622 = vrot.lane.b32.xlu0 %v1641_v21, %s1376_s19 }
  0x6d   : > { %684 = vrot.lane.b32.xlu1 %v298_v31, %s1377_s18  ;;  %668 = vrot.lane.b32.xlu0 %v278_v32, %s1377_s18 }
  0x71   : > { %356 = vrot.lane.b32.xlu1 %v1598_v3, %s1370_s22  ;;  %340 = vrot.lane.b32.xlu0 %v1601_v4, %s1370_s22  ;;  %v262_v4 = vsel %vm224_vm0, %v260_v60, %v261_v61  ;;  %v304_v60 = vrot.slane %v193_v9, 2 }
  0x75   : > { %498 = vrot.lane.b32.xlu1 %v1638_v19, %s1373_s25  ;;  %482 = vrot.lane.b32.xlu0 %v1641_v21, %s1373_s25 }
  0x79   : > { %544 = vrot.lane.b32.xlu1 %v298_v31, %s1374_s26  ;;  %528 = vrot.lane.b32.xlu0 %v278_v32, %s1374_s26 }
  0x7d   : > { %686 = vrot.lane.b32.xlu1 %v300_v41, %s1377_s18  ;;  %670 = vrot.lane.b32.xlu0 %v280_v43, %s1377_s18 }
  0x81   : > { %358 = vrot.lane.b32.xlu1 %v1638_v19, %s1370_s22  ;;  %342 = vrot.lane.b32.xlu0 %v1641_v21, %s1370_s22  ;;  %v264_v21 = vsel %vm224_vm0, %v261_v61, %v263_v14  ;;  %v284_v61 = vrot.slane %v181_v11, 2 }
  0x85   : > { %404 = vrot.lane.b32.xlu1 %v298_v31, %s1371_s23  ;;  %388 = vrot.lane.b32.xlu0 %v278_v32, %s1371_s23  ;;  %v282_v31 = vrot.slane %v1726_v59, 2 }
  0x87   : > { %v283_v36 = vsel %vm265_vm1, %v281_v30, %v282_v31 }
  0x89   : > { %546 = vrot.lane.b32.xlu1 %v300_v41, %s1374_s26  ;;  %530 = vrot.lane.b32.xlu0 %v280_v43, %s1374_s26 }
  0x8b   : > { %v1704_v47 = vpop.permute.xlu1 %334  ;;  %v1706_v48 = vpop.permute.xlu0 %332 }
  0x8d   : > { %592 = vrot.lane.b32.xlu1 %v1699_v44, %s1375_s27  ;;  %576 = vrot.lane.b32.xlu0 %v1702_v45, %s1375_s27 }
  0x8f   : > { %v1712_v49 = vpop.permute.xlu1 %350  ;;  %v1714_v51 = vpop.permute.xlu0 %348 }
  0x91   : > { %406 = vrot.lane.b32.xlu1 %v300_v41, %s1371_s23  ;;  %390 = vrot.lane.b32.xlu0 %v280_v43, %s1371_s23 }
  0x93   : > { %v1718_v54 = vpop.permute.xlu1 %396  ;;  %v1720_v55 = vpop.permute.xlu0 %380 }
  0x95   : > { %452 = vrot.lane.b32.xlu1 %v1699_v44, %s1372_s24  ;;  %436 = vrot.lane.b32.xlu0 %v1702_v45, %s1372_s24 }
  0x97   : > { %v1736_v1 = vpop.permute.xlu1 %398  ;;  %v1738_v3 = vpop.permute.xlu0 %382 }
  0x99   : > { %594 = vrot.lane.b32.xlu1 %v1723_v58, %s1375_s27  ;;  %578 = vrot.lane.b32.xlu0 %v1726_v59, %s1375_s27 }
  0x9b   : > { %v1746_v7 = vpop.permute.xlu1 %444  ;;  %v1748_v8 = vpop.permute.xlu0 %428 }
  0x9d   : > { %640 = vrot.lane.b32.xlu1 %v262_v4, %s1376_s19  ;;  %624 = vrot.lane.b32.xlu0 %v242_v5, %s1376_s19 }
  0x9f   : > { %v1754_v12 = vpop.permute.xlu1 %446  ;;  %v1756_v13 = vpop.permute.xlu0 %430 }
  0xa1   : > { %454 = vrot.lane.b32.xlu1 %v1723_v58, %s1372_s24  ;;  %438 = vrot.lane.b32.xlu0 %v1726_v59, %s1372_s24  ;;  %v1838_v58 = vld [vmem:[%s1432_s21 + $0xc8] sm:$0xff] }
  0xa2   : > { %v310_v46 = vrot.slane %v1838_v58, 1 }
  0xa3   : > { %v1762_v18 = vpop.permute.xlu1 %492  ;;  %v1764_v19 = vpop.permute.xlu0 %476 }
  0xa5   : > { %500 = vrot.lane.b32.xlu1 %v262_v4, %s1373_s25  ;;  %484 = vrot.lane.b32.xlu0 %v242_v5, %s1373_s25 }
  0xa7   : > { %v353_v32 = vpop.permute.xlu1 %352  ;;  %v337_v33 = vpop.permute.xlu0 %336 }
  0xa8   : > { %v727_v45 = vsel %vm716_vm2, %v1485_v26, %v353_v32  ;;  %v719_v44 = vsel %vm716_vm2, %v1488_v27, %v337_v33 }
  0xa9   : > { %642 = vrot.lane.b32.xlu1 %v264_v21, %s1376_s19  ;;  %626 = vrot.lane.b32.xlu0 %v244_v22, %s1376_s19 }
  0xab   : > { %v1778_v37 = vpop.permute.xlu1 %494  ;;  %v1780_v38 = vpop.permute.xlu0 %478 }
  0xad   : > { %688 = vrot.lane.b32.xlu1 %v303_v35, %s1377_s18  ;;  %672 = vrot.lane.b32.xlu0 %v283_v36, %s1377_s18 }
  0xaf   : > { %v1784_v39 = vpop.permute.xlu1 %540  ;;  %v1786_v40 = vpop.permute.xlu0 %524 }
  0xb1   : > { %360 = vrot.lane.b32.xlu1 %v262_v4, %s1370_s22  ;;  %344 = vrot.lane.b32.xlu0 %v242_v5, %s1370_s22  ;;  %v305_v4 = vsel %vm265_vm1, %v302_v25, %v304_v60  ;;  %v285_v5 = vsel %vm265_vm1, %v282_v31, %v284_v61  ;;  %v1821_v60 = vld [vmem:[%s1432_s21 + $0xc0] sm:$0xff] }
  0xb2   : > { %v309_v50 = vrot.slane %v1821_v60, 1 }
  0xb3   : > { %v1790_v41 = vpop.permute.xlu1 %354  ;;  %v1792_v43 = vpop.permute.xlu0 %338 }
  0xb5   : > { %502 = vrot.lane.b32.xlu1 %v264_v21, %s1373_s25  ;;  %486 = vrot.lane.b32.xlu0 %v244_v22, %s1373_s25 }
  0xb7   : > { %v401_v62 = vpop.permute.xlu1 %400  ;;  %v385_v63 = vpop.permute.xlu0 %384 }
  0xb9   : > { %548 = vrot.lane.b32.xlu1 %v303_v35, %s1374_s26  ;;  %532 = vrot.lane.b32.xlu0 %v283_v36, %s1374_s26 }
  0xbb   : > { %v1800_v14 = vpop.permute.xlu1 %542  ;;  %v1802_v15 = vpop.permute.xlu0 %526 }
  0xbd   : > { %690 = vrot.lane.b32.xlu1 %v305_v4, %s1377_s18  ;;  %674 = vrot.lane.b32.xlu0 %v285_v5, %s1377_s18 }
  0xbf   : > { %v1806_v9 = vpop.permute.xlu1 %588  ;;  %v1808_v11 = vpop.permute.xlu0 %572 }
  0xc1   : > { %362 = vrot.lane.b32.xlu1 %v264_v21, %s1370_s22  ;;  %346 = vrot.lane.b32.xlu0 %v244_v22, %s1370_s22  ;;  %s1139_s22 = sshll.u32 %s2231_s10, 5 }
  0xc3   : > { %v1812_v23 = vpop.permute.xlu1 %402  ;;  %v1814_v25 = vpop.permute.xlu0 %386 }
  0xc5   : > { %408 = vrot.lane.b32.xlu1 %v303_v35, %s1371_s23  ;;  %392 = vrot.lane.b32.xlu0 %v283_v36, %s1371_s23 }
  0xc7   : > { %v449_v30 = vpop.permute.xlu1 %448  ;;  %v433_v31 = vpop.permute.xlu0 %432 }
  0xc9   : > { %550 = vrot.lane.b32.xlu1 %v305_v4, %s1374_s26  ;;  %534 = vrot.lane.b32.xlu0 %v285_v5, %s1374_s26 }
  0xcb   : > { %v1823_v21 = vpop.permute.xlu1 %590  ;;  %v1825_v22 = vpop.permute.xlu0 %574 }
  0xcd   : > { %596 = vrot.lane.b32.xlu1 %v1821_v60, %s1375_s27  ;;  %580 = vrot.lane.b32.xlu0 %v1449_v10, %s1375_s27 }
  0xcf   : > { %v637_v35 = vpop.permute.xlu1 %636  ;;  %v621_v36 = vpop.permute.xlu0 %620 }
  0xd1   : > { %410 = vrot.lane.b32.xlu1 %v305_v4, %s1371_s23  ;;  %394 = vrot.lane.b32.xlu0 %v285_v5, %s1371_s23  ;;  %v744_v4 = vsel %vm733_vm3, %v727_v45, %v401_v62  ;;  %v736_v5 = vsel %vm733_vm3, %v719_v44, %v385_v63  ;;  %v717_v44 = vsel %vm716_vm2, %v1439_v2, %v1706_v48 }
  0xd2   : > { %v761_v32 = vsel %vm750_vm4, %v744_v4, %v449_v30  ;;  %v753_v42 = vsel %vm750_vm4, %v736_v5, %v433_v31  ;;  %v725_v45 = vsel %vm716_vm2, %v1449_v10, %v1714_v51  ;;  %v311_v63 = vsel %vm224_vm0, %v309_v50, %v310_v46 }
  0xd3   : > { %v1833_v61 = vpop.permute.xlu1 %450  ;;  %v1835_v59 = vpop.permute.xlu0 %434  ;;  %v742_v62 = vsel %vm733_vm3, %v725_v45, %v1718_v54  ;;  %v315_v45 = vrot.slane %v1838_v58, 2 }
  0xd4   : > { %v759_v2 = vsel %vm750_vm4, %v742_v62, %v1746_v7 }
  0xd5   : > { %456 = vrot.lane.b32.xlu1 %v1821_v60, %s1372_s24  ;;  %440 = vrot.lane.b32.xlu0 %v1449_v10, %s1372_s24  ;;  %v776_v30 = vsel %vm767_vm5, %v759_v2, %v1762_v18 }
  0xd6   : > { %v793_v50 = vsel %vm784_vm6, %v776_v30, %v1784_v39 }
  0xd7   : > { %v497_v27 = vpop.permute.xlu1 %496  ;;  %v481_v33 = vpop.permute.xlu0 %480  ;;  %v810_v7 = vsel %vm801_vm7, %v793_v50, %v1806_v9 }
  0xd8   : > { %v1855_v34 = vsel %vm767_vm5, %v761_v32, %v497_v27  ;;  %v1858_v57 = vsel %vm767_vm5, %v753_v42, %v481_v33  ;;  %v734_v42 = vsel %vm733_vm3, %v717_v44, %v1720_v55  ;;  %v827_v18 = vsel %vm818_vm8, %v810_v7, %v637_v35 }
  0xd9   : > { %598 = vrot.lane.b32.xlu1 %v1838_v58, %s1375_s27  ;;  %582 = vrot.lane.b32.xlu0 %v1444_v6, %s1375_s27  ;;  %v751_v10 = vsel %vm750_vm4, %v734_v42, %v1748_v8  ;;  %v720_v32 = vsel %vm716_vm2, %v1494_v29, %v1792_v43  ;;  %v314_v27 = vrot.slane %v1821_v60, 2 }
  0xda   : > { %v768_v54 = vsel %vm767_vm5, %v751_v10, %v1764_v19  ;;  %v737_v44 = vsel %vm733_vm3, %v720_v32, %v1814_v25 }
  0xdb   : > { %v639_v48 = vpop.permute.xlu1 %638  ;;  %v623_v51 = vpop.permute.xlu0 %622  ;;  %v785_v55 = vsel %vm784_vm6, %v768_v54, %v1786_v40  ;;  %v196_v40 = vld [vmem:[%s1432_s21 + $0xd0] sm:$0x3]  ;;  %v754_v43 = vsel %vm750_vm4, %v737_v44, %v1835_v59 }
  0xdc   : > { %v802_v8 = vsel %vm801_vm7, %v785_v55, %v1808_v11  ;;  %v312_v9 = vrot.slane %v196_v40, 1 }
  0xdd   : > { %644 = vrot.lane.b32.xlu1 %v311_v63, %s1376_s19  ;;  %628 = vrot.lane.b32.xlu0 %v1462_v17, %s1376_s19  ;;  %v819_v19 = vsel %vm818_vm8, %v802_v8, %v621_v36  ;;  %v728_v36 = vsel %vm716_vm2, %v1491_v28, %v1790_v41 }
  0xde   : > { %v745_v33 = vsel %vm733_vm3, %v728_v36, %v1812_v23  ;;  %v313_v41 = vsel %vm224_vm0, %v310_v46, %v312_v9  ;;  %v726_v46 = vsel %vm716_vm2, %v1444_v6, %v1712_v49 }
  0xdf   : > { %v685_v39 = vpop.permute.xlu1 %684  ;;  %v669_v31 = vpop.permute.xlu0 %668  ;;  %v762_v29 = vsel %vm750_vm4, %v745_v33, %v1833_v61  ;;  %v316_v61 = vsel %vm265_vm1, %v314_v27, %v315_v45 }
  0xe0   : > { %v844_v4 = vsel %vm835_vm9, %v827_v18, %v685_v39  ;;  %v836_v5 = vsel %vm835_vm9, %v819_v19, %v669_v31  ;;  %v198_v19 = vld [vmem:[%s1432_s21 + $0xe0] sm:$0xff] }
  0xe1   : > { %458 = vrot.lane.b32.xlu1 %v1838_v58, %s1372_s24  ;;  %1237 = vmatprep.mubr.msk.f32.mxu1 %vm852_vm10, %v844_v4  ;;  %v743_v58 = vsel %vm733_vm3, %v726_v46, %v1736_v1  ;;  %v323_v31 = vrot.slane %v198_v19, 1  ;;  %v2211_v4 = vld [vmem:[#allocation6_spill] sm:$0xff] }
  0xe2   : > { %442 = vrot.lane.b32.xlu0 %v1444_v6, %s1372_s24  ;;  %1225 = vmatprep.mubr.msk.f32.mxu0 %vm852_vm10, %v836_v5 }
  0xe3   : > { %v357_v11 = vpop.permute.xlu1 %356  ;;  %v341_v35 = vpop.permute.xlu0 %340 }
  0xe4   : > { %v729_v30 = vsel %vm716_vm2, %v1552_v52, %v357_v11  ;;  %v197_v52 = vld [vmem:[%s1432_s21 + $0xd8] sm:$0xff] }
  0xe5   : > { %504 = vrot.lane.b32.xlu1 %v311_v63, %s1373_s25  ;;  %v322_v39 = vrot.slane %v197_v52, 1 }
  0xe6   : > { %488 = vrot.lane.b32.xlu0 %v1462_v17, %s1373_s25  ;;  %v718_v17 = vsel %vm716_vm2, %v1435_v0, %v1704_v47  ;;  %v760_v0 = vsel %vm750_vm4, %v743_v58, %v1754_v12 }
  0xe7   : > { %v499_v60 = vpop.permute.xlu1 %498  ;;  %v483_v62 = vpop.permute.xlu0 %482  ;;  %v735_v59 = vsel %vm733_vm3, %v718_v17, %v1738_v3  ;;  %v777_v1 = vsel %vm767_vm5, %v760_v0, %v1778_v37 }
  0xe8   : > { %v1926_v23 = vsel %vm767_vm5, %v762_v29, %v499_v60  ;;  %v1929_v25 = vsel %vm767_vm5, %v754_v43, %v483_v62  ;;  %v752_v47 = vsel %vm750_vm4, %v735_v59, %v1756_v13  ;;  %v794_v42 = vsel %vm784_vm6, %v777_v1, %v1800_v14  ;;  %v2212_v29 = vld [vmem:[#allocation2_spill] sm:$0xff]  ;;  %v2213_v62 = vld [vmem:[#allocation3_spill] sm:$0xff] }
  0xe9   : > { %646 = vrot.lane.b32.xlu1 %v313_v41, %s1376_s19  ;;  %v769_v3 = vsel %vm767_vm5, %v752_v47, %v1780_v38  ;;  %v811_v12 = vsel %vm801_vm7, %v794_v42, %v1823_v21  ;;  %v317_v21 = vrot.slane %v196_v40, 2 }
  0xea   : > { %630 = vrot.lane.b32.xlu0 %v1459_v16, %s1376_s19  ;;  %v786_v63 = vsel %vm784_vm6, %v769_v3, %v1802_v15  ;;  %v828_v37 = vsel %vm818_vm8, %v811_v12, %v639_v48 }
  0xeb   : > { %v1949_v6 = vpop.permute.xlu1 %544  ;;  %v1951_v49 = vpop.permute.xlu0 %528  ;;  %v803_v13 = vsel %vm801_vm7, %v786_v63, %v1825_v22  ;;  %v2215_v63 = vld [vmem:[#allocation5_spill] sm:$0xff] }
  0xec   : > { %v820_v38 = vsel %vm818_vm8, %v803_v13, %v623_v51  ;;  %v318_v51 = vsel %vm265_vm1, %v315_v45, %v317_v21  ;;  %v327_v45 = vrot.slane %v197_v52, 2 }
  0xed   : > { %692 = vrot.lane.b32.xlu1 %v316_v61, %s1377_s18 }
  0xee   : > { %676 = vrot.lane.b32.xlu0 %v1471_v20, %s1377_s18 }
  0xef   : > { %v687_v2 = vpop.permute.xlu1 %686  ;;  %v671_v14 = vpop.permute.xlu0 %670 }
  0xf0   : > { %v845_v10 = vsel %vm835_vm9, %v828_v37, %v687_v2  ;;  %v837_v15 = vsel %vm835_vm9, %v820_v38, %v671_v14 }
  0xf1   : > { %506 = vrot.lane.b32.xlu1 %v313_v41, %s1373_s25  ;;  %1238 = vmatmul.mubr.msk.f32.vlgmr.msra.gmra.mxu1 %vm852_vm10, %v845_v10  ;;  %v328_v41 = vrot.slane %v198_v19, 2  ;;  %v795_v10 = vsel %vm784_vm6, %v1855_v34, %v1949_v6 }
  0xf2   : > { %490 = vrot.lane.b32.xlu0 %v1459_v16, %s1373_s25  ;;  %1226 = vmatmul.mubr.msk.f32.vlgmr.msra.gmra.mxu0 %vm852_vm10, %v837_v15  ;;  %v721_v16 = vsel %vm716_vm2, %v1555_v53, %v341_v35  ;;  %v787_v15 = vsel %vm784_vm6, %v1858_v57, %v1951_v49 }
  0xf3   : > { %v359_v22 = vpop.permute.xlu1 %358  ;;  %v343_v48 = vpop.permute.xlu0 %342  ;;  %v329_v17 = vsel %vm265_vm1, %v327_v45, %v328_v41 }
  0xf4   : > { %v730_v40 = vsel %vm716_vm2, %v1571_v56, %v359_v22  ;;  %v722_v5 = vsel %vm716_vm2, %v2211_v4, %v343_v48 }
  0xf5   : > { %552 = vrot.lane.b32.xlu1 %v316_v61, %s1374_s26  ;;  %v2214_v61 = vld [vmem:[#allocation4_spill] sm:$0xff] }
  0xf6   : > { %536 = vrot.lane.b32.xlu0 %v1471_v20, %s1374_s26 }
  0xf7   : > { %v405_v54 = vpop.permute.xlu1 %404  ;;  %v389_v50 = vpop.permute.xlu0 %388 }
  0xf8   : > { %v746_v55 = vsel %vm733_vm3, %v729_v30, %v405_v54  ;;  %v738_v7 = vsel %vm733_vm3, %v721_v16, %v389_v50 }
  0xf9   : > { %694 = vrot.lane.b32.xlu1 %v318_v51, %s1377_s18 }
  0xfa   : > { %678 = vrot.lane.b32.xlu0 %v1478_v24, %s1377_s18 }
  0xfb   : > { %v1990_v20 = vpop.permute.xlu1 %546  ;;  %v1992_v8 = vpop.permute.xlu0 %530 }
  0xfd   : > { %554 = vrot.lane.b32.xlu1 %v318_v51, %s1374_s26 }
  0xfe   : > { %538 = vrot.lane.b32.xlu0 %v1478_v24, %s1374_s26  ;;  %v199_v24 = vld [vmem:[%s1432_s21 + $0xe8] sm:$0x3]  ;;  %s1138_s21 = sshll.u32 %s1352_s9, 4 }
  0xff   : > { %v593_v53 = vpop.permute.xlu1 %592  ;;  %v577_v18 = vpop.permute.xlu0 %576  ;;  %v325_v32 = vrot.slane %v199_v24, 1  ;;  %v330_v46 = vrot.slane %v199_v24, 2  ;;  %p160_p6 = scmp.lt.s32.totalorder %s1138_s21, 31 }
 0x100   : > { %v812_v21 = vsel %vm801_vm7, %v795_v10, %v593_v53  ;;  %v804_v22 = vsel %vm801_vm7, %v787_v15, %v577_v18  ;;  %v796_v18 = vsel %vm784_vm6, %v1926_v23, %v1990_v20  ;;  %v2216_v20 = vld [vmem:[#allocation7_spill] sm:$0xff] }
 0x101   : > { %600 = vrot.lane.b32.xlu1 %v197_v52, %s1375_s27  ;;  %v326_v43 = vsel %vm224_vm0, %v323_v31, %v325_v32  ;;  %v331_v0 = vsel %vm265_vm1, %v328_v41, %v330_v46  ;;  %s2233_s21 = smov (!%p160_p6, %s1138_s21), 31 }
 0x102   : > { %584 = vrot.lane.b32.xlu0 %v1485_v26, %s1375_s27  ;;  %v324_v26 = vsel %vm224_vm0, %v322_v39, %v323_v31  ;;  %s163_s23 = sadd.s32 %s1139_s22, %s2233_s21 }
 0x103   : > { %v407_v9 = vpop.permute.xlu1 %406  ;;  %v391_v11 = vpop.permute.xlu0 %390  ;;  %s1140_s24 = sshll.u32 %s163_s23, 3 }
 0x104   : > { %v747_v35 = vsel %vm733_vm3, %v730_v40, %v407_v9  ;;  %v739_v36 = vsel %vm733_vm3, %v722_v5, %v391_v11 }
 0x105   : > { %602 = vrot.lane.b32.xlu1 %v198_v19, %s1375_s27  ;;  %v788_v19 = vsel %vm784_vm6, %v1929_v25, %v1992_v8 }
 0x106   : > { %586 = vrot.lane.b32.xlu0 %v1491_v28, %s1375_s27  ;;  %s2141_s27 = scalar_lea.vmem %s2192_s2, %s1140_s24 }
 0x107   : > { %v453_v27 = vpop.permute.xlu1 %452  ;;  %v437_v56 = vpop.permute.xlu0 %436 }
 0x108   : > { %v763_v33 = vsel %vm750_vm4, %v746_v55, %v453_v27  ;;  %v755_v44 = vsel %vm750_vm4, %v738_v7, %v437_v56 }
 0x109   : > { %648 = vrot.lane.b32.xlu1 %v324_v26, %s1376_s19 }
 0x10a   : > { %632 = vrot.lane.b32.xlu0 %v2212_v29, %s1376_s19 }
 0x10b   : > { %v595_v60 = vpop.permute.xlu1 %594  ;;  %v579_v28 = vpop.permute.xlu0 %578 }
 0x10c   : > { %v813_v39 = vsel %vm801_vm7, %v796_v18, %v595_v60  ;;  %v805_v31 = vsel %vm801_vm7, %v788_v19, %v579_v28 }
 0x10d   : > { %650 = vrot.lane.b32.xlu1 %v326_v43, %s1376_s19 }
 0x10e   : > { %634 = vrot.lane.b32.xlu0 %v2213_v62, %s1376_s19 }
 0x10f   : > { %v641_v58 = vpop.permute.xlu1 %640  ;;  %v625_v59 = vpop.permute.xlu0 %624 }
 0x110   : > { %v829_v48 = vsel %vm818_vm8, %v812_v21, %v641_v58  ;;  %v821_v51 = vsel %vm818_vm8, %v804_v22, %v625_v59 }
 0x111   : > { %696 = vrot.lane.b32.xlu1 %v329_v17, %s1377_s18 }
 0x112   : > { %680 = vrot.lane.b32.xlu0 %v2214_v61, %s1377_s18 }
 0x113   : > { %v455_v47 = vpop.permute.xlu1 %454  ;;  %v439_v1 = vpop.permute.xlu0 %438 }
 0x114   : > { %v764_v3 = vsel %vm750_vm4, %v747_v35, %v455_v47  ;;  %v756_v42 = vsel %vm750_vm4, %v739_v36, %v439_v1  ;;  %v2217_v35 = vld [vmem:[#allocation8_spill] sm:$0xff] }
 0x115   : > { %698 = vrot.lane.b32.xlu1 %v331_v0, %s1377_s18 }
 0x116   : > { %682 = vrot.lane.b32.xlu0 %v2215_v63, %s1377_s18 }
 0x117   : > { %v501_v12 = vpop.permute.xlu1 %500  ;;  %v485_v13 = vpop.permute.xlu0 %484 }
 0x118   : > { %v2033_v37 = vsel %vm767_vm5, %v763_v33, %v501_v12  ;;  %v2036_v38 = vsel %vm767_vm5, %v755_v44, %v485_v13 }
 0x11b   : > { %v643_v2 = vpop.permute.xlu1 %642  ;;  %v627_v14 = vpop.permute.xlu0 %626 }
 0x11c   : > { %v830_v40 = vsel %vm818_vm8, %v813_v39, %v643_v2  ;;  %v822_v4 = vsel %vm818_vm8, %v805_v31, %v627_v14 }
 0x11f   : > { %v689_v30 = vpop.permute.xlu1 %688  ;;  %v673_v16 = vpop.permute.xlu0 %672 }
 0x120   : > { %v846_v54 = vsel %vm835_vm9, %v829_v48, %v689_v30  ;;  %v838_v50 = vsel %vm835_vm9, %v821_v51, %v673_v16 }
 0x121   : > { %1228 = vmatprep.mubr.msk.f32.mxu0 %vm852_vm10, %v838_v50  ;;  %1240 = vmatprep.mubr.msk.f32.mxu1 %vm852_vm10, %v846_v54 }
 0x123   : > { %v361_v34 = vpop.permute.xlu1 %360  ;;  %v345_v57 = vpop.permute.xlu0 %344 }
 0x124   : > { %v731_v8 = vsel %vm716_vm2, %v2216_v20, %v361_v34  ;;  %v723_v36 = vsel %vm716_vm2, %v2217_v35, %v345_v57 }
 0x127   : > { %v503_v6 = vpop.permute.xlu1 %502  ;;  %v487_v49 = vpop.permute.xlu0 %486 }
 0x128   : > { %v781_v55 = vsel %vm767_vm5, %v764_v3, %v503_v6  ;;  %v773_v7 = vsel %vm767_vm5, %v756_v42, %v487_v49 }
 0x12b   : > { %v549_v52 = vpop.permute.xlu1 %548  ;;  %v533_v53 = vpop.permute.xlu0 %532 }
 0x12c   : > { %v797_v42 = vsel %vm784_vm6, %v2033_v37, %v549_v52  ;;  %v789_v63 = vsel %vm784_vm6, %v2036_v38, %v533_v53 }
 0x12f   : > { %v691_v5 = vpop.permute.xlu1 %690  ;;  %v675_v9 = vpop.permute.xlu0 %674 }
 0x130   : > { %v847_v11 = vsel %vm835_vm9, %v830_v40, %v691_v5  ;;  %v839_v24 = vsel %vm835_vm9, %v822_v4, %v675_v9 }
 0x131   : > { %1229 = vmatmul.mubr.msk.f32.gmra.mxu0 %vm852_vm10, %v839_v24  ;;  %1241 = vmatmul.mubr.msk.f32.gmra.mxu1 %vm852_vm10, %v847_v11 }
 0x133   : > { %v2068_v23 = vpop.permute.xlu1 %362  ;;  %v2070_v25 = vpop.permute.xlu0 %346 }
 0x137   : > { %v409_v26 = vpop.permute.xlu1 %408  ;;  %v393_v32 = vpop.permute.xlu0 %392 }
 0x138   : > { %v748_v27 = vsel %vm733_vm3, %v731_v8, %v409_v26  ;;  %v740_v56 = vsel %vm733_vm3, %v723_v36, %v393_v32  ;;  %v2218_v8 = vld [vmem:[#allocation9_spill] sm:$0xff]  ;;  %v2219_v32 = vld [vmem:[#allocation10_spill] sm:$0xff] }
 0x139   : > { %v732_v35 = vsel %vm716_vm2, %v2218_v8, %v2068_v23 }
 0x13b   : > { %v551_v33 = vpop.permute.xlu1 %550  ;;  %v535_v44 = vpop.permute.xlu0 %534 }
 0x13c   : > { %v798_v30 = vsel %vm784_vm6, %v781_v55, %v551_v33  ;;  %v790_v16 = vsel %vm784_vm6, %v773_v7, %v535_v44  ;;  %v724_v33 = vsel %vm716_vm2, %v2219_v32, %v2070_v25 }
 0x13f   : > { %v597_v45 = vpop.permute.xlu1 %596  ;;  %v581_v41 = vpop.permute.xlu0 %580 }
 0x140   : > { %v814_v12 = vsel %vm801_vm7, %v797_v42, %v597_v45  ;;  %v806_v13 = vsel %vm801_vm7, %v789_v63, %v581_v41 }
 0x143   : > { %v411_v29 = vpop.permute.xlu1 %410  ;;  %v395_v43 = vpop.permute.xlu0 %394 }
 0x144   : > { %v741_v45 = vsel %vm733_vm3, %v724_v33, %v395_v43 }
 0x147   : > { %v457_v60 = vpop.permute.xlu1 %456  ;;  %v441_v28 = vpop.permute.xlu0 %440 }
 0x148   : > { %v765_v5 = vsel %vm750_vm4, %v748_v27, %v457_v60  ;;  %v757_v11 = vsel %vm750_vm4, %v740_v56, %v441_v28  ;;  %v749_v27 = vsel %vm733_vm3, %v732_v35, %v411_v29 }
 0x14b   : > { %v599_v62 = vpop.permute.xlu1 %598  ;;  %v583_v17 = vpop.permute.xlu0 %582 }
 0x14c   : > { %v815_v54 = vsel %vm801_vm7, %v798_v30, %v599_v62  ;;  %v807_v50 = vsel %vm801_vm7, %v790_v16, %v583_v17 }
 0x14f   : > { %v645_v46 = vpop.permute.xlu1 %644  ;;  %v629_v58 = vpop.permute.xlu0 %628 }
 0x150   : > { %v831_v2 = vsel %vm818_vm8, %v814_v12, %v645_v46  ;;  %v823_v10 = vsel %vm818_vm8, %v806_v13, %v629_v58 }
 0x153   : > { %v459_v59 = vpop.permute.xlu1 %458 }
 0x154   : > { %v443_v61 = vpop.permute.xlu0 %442  ;;  %v766_v41 = vsel %vm750_vm4, %v749_v27, %v459_v59 }
 0x155   : > { %v758_v62 = vsel %vm750_vm4, %v741_v45, %v443_v61 }
 0x157   : > { %v505_v0 = vpop.permute.xlu1 %504 }
 0x158   : > { %v489_v47 = vpop.permute.xlu0 %488  ;;  %v782_v24 = vsel %vm767_vm5, %v765_v5, %v505_v0 }
 0x159   : > { %v774_v36 = vsel %vm767_vm5, %v757_v11, %v489_v47 }
 0x15b   : > { %v647_v1 = vpop.permute.xlu1 %646 }
 0x15c   : > { %v631_v3 = vpop.permute.xlu0 %630  ;;  %v832_v34 = vsel %vm818_vm8, %v815_v54, %v647_v1 }
 0x15d   : > { %v824_v6 = vsel %vm818_vm8, %v807_v50, %v631_v3 }
 0x15f   : > { %v693_v14 = vpop.permute.xlu1 %692 }
 0x160   : > { %v848_v15 = vsel %vm835_vm9, %v831_v2, %v693_v14  ;;  %v677_v21 = vpop.permute.xlu0 %676 }
 0x161   : > { %v840_v22 = vsel %vm835_vm9, %v823_v10, %v677_v21  ;;  %1243 = vmatprep.mubr.msk.f32.mxu1 %vm852_vm10, %v848_v15 }
 0x162   : > { %1231 = vmatprep.mubr.msk.f32.mxu0 %vm852_vm10, %v840_v22 }
 0x163   : > { %v507_v37 = vpop.permute.xlu1 %506 }
 0x164   : > { %v491_v38 = vpop.permute.xlu0 %490  ;;  %v783_v17 = vsel %vm767_vm5, %v766_v41, %v507_v37 }
 0x165   : > { %v775_v58 = vsel %vm767_vm5, %v758_v62, %v491_v38 }
 0x167   : > { %v553_v48 = vpop.permute.xlu1 %552 }
 0x168   : > { %v537_v51 = vpop.permute.xlu0 %536  ;;  %v799_v26 = vsel %vm784_vm6, %v782_v24, %v553_v48 }
 0x169   : > { %v791_v44 = vsel %vm784_vm6, %v774_v36, %v537_v51 }
 0x16b   : > { %v695_v57 = vpop.permute.xlu1 %694 }
 0x16c   : > { %v849_v49 = vsel %vm835_vm9, %v832_v34, %v695_v57  ;;  %v679_v52 = vpop.permute.xlu0 %678 }
 0x16d   : > { %v841_v53 = vsel %vm835_vm9, %v824_v6, %v679_v52  ;;  %1244 = vmatmul.mubr.msk.f32.gmra.mxu1 %vm852_vm10, %v849_v49 }
 0x16e   : > { %1232 = vmatmul.mubr.msk.f32.gmra.mxu0 %vm852_vm10, %v841_v53 }
 0x16f   : > { %v555_v55 = vpop.permute.xlu1 %554 }
 0x170   : > { %v539_v7 = vpop.permute.xlu0 %538  ;;  %v800_v43 = vsel %vm784_vm6, %v783_v17, %v555_v55 }
 0x171   : > { %v792_v0 = vsel %vm784_vm6, %v775_v58, %v539_v7 }
 0x173   : > { %v601_v18 = vpop.permute.xlu1 %600 }
 0x174   : > { %v585_v19 = vpop.permute.xlu0 %584  ;;  %v816_v56 = vsel %vm801_vm7, %v799_v26, %v601_v18 }
 0x175   : > { %v808_v23 = vsel %vm801_vm7, %v791_v44, %v585_v19 }
 0x177   : > { %v603_v39 = vpop.permute.xlu1 %602 }
 0x178   : > { %v587_v31 = vpop.permute.xlu0 %586  ;;  %v817_v61 = vsel %vm801_vm7, %v800_v43, %v603_v39 }
 0x179   : > { %v809_v47 = vsel %vm801_vm7, %v792_v0, %v587_v31 }
 0x17b   : > { %v649_v40 = vpop.permute.xlu1 %648 }
 0x17c   : > { %v633_v4 = vpop.permute.xlu0 %632  ;;  %v833_v60 = vsel %vm818_vm8, %v816_v56, %v649_v40 }
 0x17d   : > { %v825_v25 = vsel %vm818_vm8, %v808_v23, %v633_v4 }
 0x17f   : > { %v651_v9 = vpop.permute.xlu1 %650 }
 0x180   : > { %v635_v20 = vpop.permute.xlu0 %634  ;;  %v834_v1 = vsel %vm818_vm8, %v817_v61, %v651_v9 }
 0x181   : > { %v826_v42 = vsel %vm818_vm8, %v809_v47, %v635_v20 }
 0x183   : > { %v697_v28 = vpop.permute.xlu1 %696 }
 0x184   : > { %v850_v29 = vsel %vm835_vm9, %v833_v60, %v697_v28  ;;  %v681_v46 = vpop.permute.xlu0 %680 }
 0x185   : > { %v842_v59 = vsel %vm835_vm9, %v825_v25, %v681_v46  ;;  %1246 = vmatprep.mubr.msk.f32.mxu1 %vm852_vm10, %v850_v29 }
 0x186   : > { %1234 = vmatprep.mubr.msk.f32.mxu0 %vm852_vm10, %v842_v59 }
 0x187   : > { %v699_v3 = vpop.permute.xlu1 %698 }
 0x188   : > { %v851_v63 = vsel %vm835_vm9, %v834_v1, %v699_v3  ;;  %v683_v12 = vpop.permute.xlu0 %682 }
 0x189   : > { %v843_v13 = vsel %vm835_vm9, %v826_v42, %v683_v12  ;;  %1247 = vmatmul.mubr.msk.f32.gmra.mxu1 %vm852_vm10, %v851_v63 }
 0x18a   : > { %1235 = vmatmul.mubr.msk.f32.gmra.mxu0 %vm852_vm10, %v843_v13 }
 0x1b1   : > { %v1239_v2 = vpop.f32.mrf.mxu1 }
 0x1b2   : > { %v1227_v14 = vpop.f32.mrf.mxu0  ;;  %1039 = vst.msk [vmem:[%s2141_s27 + $0x48] sm:$0xff] %vm733_vm3, %v1239_v2 }
 0x1b3   : > { %1031 = vst.msk [vmem:[%s2141_s27 + $0x8] sm:$0xff] %vm733_vm3, %v1227_v14  ;;  %v991_v10 = vpop.f32.mrf.mxu1 }
 0x1b4   : > { %v951_v15 = vpop.f32.mrf.mxu0  ;;  %1038 = vst.msk [vmem:[%s2141_s27 + $0x40] sm:$0xff] %vm733_vm3, %v991_v10 }
 0x1b5   : > { %1030 = vst.msk [vmem:[%s2141_s27] sm:$0xff] %vm733_vm3, %v951_v15 }
 0x1f1   : > { %v1230_v21 = vpop.f32.mrf.mxu0  ;;  %v1242_v22 = vpop.f32.mrf.mxu1 }
 0x1f2   : > { %1033 = vst.msk [vmem:[%s2141_s27 + $0x18] sm:$0xff] %vm733_vm3, %v1230_v21  ;;  %1041 = vst.msk [vmem:[%s2141_s27 + $0x58] sm:$0xff] %vm733_vm3, %v1242_v22 }
 0x1f3   : > { %v961_v37 = vpop.f32.mrf.mxu0  ;;  %v1001_v38 = vpop.f32.mrf.mxu1 }
 0x1f4   : > { %1032 = vst.msk [vmem:[%s2141_s27 + $0x10] sm:$0xff] %vm733_vm3, %v961_v37  ;;  %1040 = vst.msk [vmem:[%s2141_s27 + $0x50] sm:$0xff] %vm733_vm3, %v1001_v38 }
 0x22d   : > { %v1245_v48 = vpop.f32.mrf.mxu1 }
 0x22e   : > { %v1233_v51 = vpop.f32.mrf.mxu0  ;;  %1043 = vst.msk [vmem:[%s2141_s27 + $0x68] sm:$0xff] %vm733_vm3, %v1245_v48 }
 0x22f   : > { %1035 = vst.msk [vmem:[%s2141_s27 + $0x28] sm:$0xff] %vm733_vm3, %v1233_v51  ;;  %v1011_v30 = vpop.f32.mrf.mxu1 }
 0x230   : > { %v971_v16 = vpop.f32.mrf.mxu0  ;;  %1042 = vst.msk [vmem:[%s2141_s27 + $0x60] sm:$0xff] %vm733_vm3, %v1011_v30 }
 0x231   : > { %1034 = vst.msk [vmem:[%s2141_s27 + $0x20] sm:$0xff] %vm733_vm3, %v971_v16 }
 0x249   : > { %v1248_v54 = vpop.f32.mrf.mxu1 }
 0x24a   : > { %v1236_v50 = vpop.f32.mrf.mxu0  ;;  %1045 = vst.msk [vmem:[%s2141_s27 + $0x78] sm:$0xff] %vm733_vm3, %v1248_v54 }
 0x24b   : > { %1037 = vst.msk [vmem:[%s2141_s27 + $0x38] sm:$0xff] %vm733_vm3, %v1236_v50  ;;  %v1021_v34 = vpop.f32.mrf.mxu1 }
 0x24c   : > { %v981_v57 = vpop.f32.mrf.mxu0  ;;  %1044 = vst.msk [vmem:[%s2141_s27 + $0x70] sm:$0xff] %vm733_vm3, %v1021_v34 }
 0x24d   : > { %1036 = vst.msk [vmem:[%s2141_s27 + $0x30] sm:$0xff] %vm733_vm3, %v981_v57 }
 0x24e PF: > { %s12_s13 = sadd.s32 1, %s1368_s13   ;;  %s2220_s9 = smov %s1360_s11 }
 0x24f   : > { %p9_p7 = scmp.ge.s32.totalorder %s12_s13, 6   ;;  %s2221_s10 = smov %s1364_s12 }
 0x250   : > { %s2222_s11 = smov %s2225_s14  ;;  %s2223_s12 = smov %s2229_s15 }
 0x251   :  { %11 = sbr.rel (!%p9_p7) target bundleno = 3 (0x3), region = 59 }

</bundles_post_ra>
